<compile_context>
chip_gen: v6e
topology: v6e:2x2x1
jax: 0.10.0
libtpu: 0.0.40
codegen_flags: <defaults>
</compile_context>

<pallas_src>
import functools

import numpy as np

import jax
import jax.numpy as jnp
from jax.experimental import pallas as pl
from jax.experimental.pallas import tpu as pltpu


# ----------------------------- Pallas kernel ---------------------------------
def _conv3x3_kernel(x_ref, w_ref, b_ref, o_ref, *, th):
    # x_ref: (H+2, (W+2)*C)  f32  -- whole padded image (resident per batch element)
    # w_ref: (3, (W+2)*C, W*Cout) bf16 -- per-dy Toeplitz-expanded conv weights
    # b_ref: (1, W*Cout)     f32  -- bias tiled across W
    # o_ref: (th, W*Cout)    f32  -- lane-dense output row tile
    i = pl.program_id(1)
    row0 = pl.multiple_of(i * th, th)            # sublane-aligned dynamic row offset
    xwin = x_ref[pl.ds(row0, th + 2), :]          # (th+2, (W+2)*C) rows incl. halo

    acc = jnp.zeros(o_ref.shape, jnp.float32)
    for dy in range(3):                           # 3 shifted row-blocks, one dot each
        lhs = xwin[dy:dy + th, :].astype(jnp.bfloat16)
        acc = acc + jnp.dot(lhs, w_ref[dy], preferred_element_type=jnp.float32)

    o_ref[...] = jnp.maximum(acc + b_ref[...], 0.0).astype(o_ref.dtype)


def _pick_row_tile(H: int) -> int:
    """Largest row tile that divides H, is sublane-aligned (x8), and leaves >=2
    row blocks so the grid has >= 2*B steps (keeps both v7x TensorCores busy)."""
    for th in (64, 32, 16, 8):
        if H % th == 0 and H // th >= 2:
            return th
    return H  # full-height fallback (always a legal "full dim" block)


@functools.partial(jax.jit, static_argnames=("H", "W", "Cout", "th"))
def _conv3x3_bias_relu(xflat, w_toe, b_row, *, H, W, Cout, th):
    """xflat: (B, H+2, (W+2)*C) f32, w_toe: (3, (W+2)*C, W*Cout) bf16,
    b_row: (1, W*Cout) f32  ->  (B, H, W*Cout) f32."""
    B = xflat.shape[0]
    WpC = xflat.shape[2]
    n_row_blocks = H // th

    kernel = functools.partial(_conv3x3_kernel, th=th)
    return pl.pallas_call(
        kernel,
        out_shape=jax.ShapeDtypeStruct((B, H, W * Cout), jnp.float32),
        grid_spec=pltpu.PrefetchScalarGridSpec(
            num_scalar_prefetch=0,
            grid=(B, n_row_blocks),
            in_specs=[
                # Padded image: block index constant over the row axis -> DMA'd once
                # per batch element and kept resident in VMEM.
                pl.BlockSpec((None, H + 2, WpC), lambda b, i: (b, 0, 0)),
                # Weights / bias: constant block index -> resident for the whole call.
                pl.BlockSpec((3, WpC, W * Cout), lambda b, i: (0, 0, 0)),
                pl.BlockSpec((1, W * Cout), lambda b, i: (0, 0)),
            ],
            out_specs=pl.BlockSpec((None, th, W * Cout), lambda b, i: (b, i, 0)),
        ),
        compiler_params=pltpu.CompilerParams(
            dimension_semantics=("parallel", "parallel"),
            # Footprint here is <1 MiB; 32 MiB is within every generation's scoped
            # budget (incl. v7x's 64 MiB physical VMEM).
            vmem_limit_bytes=32 * 1024 * 1024,
        ),
    )(xflat, w_toe, b_row)


# ------------------------------ Backbone wrapper ------------------------------
class PallasBackbone:
    """Minimal concrete Backbone: 3x3 conv stem + ReLU, feature name 'res2'."""

    def __init__(self, in_channels: int, out_channels: int, key):
        k_w, k_b = jax.random.split(key)
        # PyTorch conv weight layout: (Cout, Cin, kh, kw)
        self.weight = (
            jax.random.normal(k_w, (out_channels, in_channels, 3, 3), jnp.float32)
            * 0.1
        )
        self.bias = jax.random.normal(k_b, (out_channels,), jnp.float32) * 0.1
        self.in_channels = in_channels
        self.out_channels = out_channels
        # Kernel-layout params are packed once per spatial width and cached
        # (W is only known at forward time), instead of per forward() call.
        self._packed_cache = {}

    @property
    def size_divisibility(self) -> int:
        return 0

    # TODO(synk): finetune_parameters (optimizer weight-decay grouping) is a training
    # utility with no Pallas-kernel equivalent; omitted.

    def _packed_params(self, W: int):
        if W not in self._packed_cache:
            C, Cout = self.in_channels, self.out_channels
            w_np = np.asarray(self.weight, dtype=np.float32)  # (Cout, C, 3, 3)
            # Per-dy Toeplitz expansion:
            #   T[dy, u*C+ci, w*Cout+co] = weight[co, ci, dy, u-w]  if u-w in {0,1,2}
            T = np.zeros((3, W + 2, C, W * Cout), np.float32)
            for dy in range(3):
                for dx in range(3):
                    ktap = w_np[:, :, dy, dx].T                 # (C, Cout)
                    for w in range(W):
                        T[dy, w + dx, :, w * Cout:(w + 1) * Cout] = ktap
            w_toe = jnp.asarray(
                T.reshape(3, (W + 2) * C, W * Cout), dtype=jnp.bfloat16
            )
            b_row = jnp.tile(self.bias, W).reshape(1, W * Cout)  # f32
            self._packed_cache[W] = (w_toe, b_row)
        return self._packed_cache[W]

    def forward(self, x_nchw, permute: bool):
        B, C, H, W = x_nchw.shape
        assert C == self.in_channels
        Cout = self.out_channels
        w_toe, b_row = self._packed_params(W)

        # Layout glue (~1x input bytes): NCHW -> NHWC, spatial zero pad for SAME conv,
        # then fold (W, C) into one minor axis so kernel rows are contiguous.
        x = jnp.transpose(x_nchw, (0, 2, 3, 1))                 # (B, H, W, C)
        xp = jnp.pad(x, ((0, 0), (1, 1), (1, 1), (0, 0)))        # (B, H+2, W+2, C)
        xflat = xp.reshape(B, H + 2, (W + 2) * C)

        th = _pick_row_tile(H)
        out = _conv3x3_bias_relu(xflat, w_toe, b_row, H=H, W=W, Cout=Cout, th=th)

        feat_nhwc = out.reshape(B, H, W, Cout)
        if permute:
            feat = feat_nhwc                                     # channel-last
        else:
            feat = jnp.transpose(feat_nhwc, (0, 3, 1, 2))        # NCHW (PyTorch)
        return {"res2": feat}


# ---------------------------------- main --------------------------------------
if __name__ == "__main__":
    key = jax.random.PRNGKey(0)
    k_in, k_params = jax.random.split(key)

    B, C, H, W = 2, 4, 16, 16
    Cout = 32
    x = jax.random.normal(k_in, (B, C, H, W), jnp.float32)

    backbone = PallasBackbone(in_channels=C, out_channels=Cout, key=k_params)

    feats = backbone.forward(x, permute=False)
    res2 = jax.block_until_ready(feats["res2"])
    assert res2.shape == (B, Cout, H, W), res2.shape

    # Reference: lax.conv on the same bf16-rounded operands (the kernel feeds the MXU
    # bf16 inputs with f32 accumulation), f32 bias + ReLU.
    xb = x.astype(jnp.bfloat16).astype(jnp.float32)
    wb = backbone.weight.astype(jnp.bfloat16).astype(jnp.float32)
    ref = jax.lax.conv_general_dilated(
        xb, wb, window_strides=(1, 1), padding="SAME",
        dimension_numbers=("NCHW", "OIHW", "NCHW"),
    ) + backbone.bias.reshape(1, Cout, 1, 1)
    ref = jnp.maximum(ref, 0.0)
    max_err = float(jnp.max(jnp.abs(res2 - ref)))
    assert jnp.allclose(res2, ref, atol=1e-3, rtol=1e-3), max_err

    # permute=True path (NHWC feature)
    feats_p = backbone.forward(x, permute=True)
    res2_p = jax.block_until_ready(feats_p["res2"])
    assert res2_p.shape == (B, H, W, Cout), res2_p.shape

    print("KERNEL_OK")
</pallas_src>

<mosaic_0001>
module attributes {stable_mosaic.version = 11 : i64} {
  func.func @_conv3x3_kernel(%arg0: i32, %arg1: i32, %arg2: memref<1x18x72xf32, #tpu.memory_space<vmem>>, %arg3: memref<3x72x512xbf16, #tpu.memory_space<vmem>>, %arg4: memref<1x512xf32, #tpu.memory_space<vmem>>, %arg5: memref<1x8x512xf32, #tpu.memory_space<vmem>>) attributes {dimension_semantics = [#tpu.dimension_semantics<parallel>, #tpu.dimension_semantics<parallel>], iteration_bounds = array<i64: 2, 2>, scalar_prefetch = 0 : i64, scratch_operands = 0 : i64, tpu.core_type = #tpu.core_type<tc>, window_params = [{transform_indices = @transform_0, window_bounds = array<i64: 1, 18, 72>}, {pipeline_mode = #tpu.pipeline_mode<synchronous>, transform_indices = @transform_1, window_bounds = array<i64: 3, 72, 512>}, {pipeline_mode = #tpu.pipeline_mode<synchronous>, transform_indices = @transform_2, window_bounds = array<i64: 1, 512>}, {transform_indices = @transform_3, window_bounds = array<i64: 1, 8, 512>}]} {
    %c8_i32 = arith.constant 8 : i32
    %0 = arith.muli %arg1, %c8_i32 : i32
    %1 = tpu.assume_multiple %0, 8 : i32
    %c0 = arith.constant 0 : index
    %2 = arith.index_cast %1 : i32 to index
    %c0_0 = arith.constant 0 : index
    %3 = vector.load %arg2[%c0, %2, %c0_0] : memref<1x18x72xf32, #tpu.memory_space<vmem>>, vector<1x10x72xf32>
    %4 = vector.shape_cast %3 : vector<1x10x72xf32> to vector<10x72xf32>
    %cst = arith.constant 0.000000e+00 : f32
    %5 = vector.broadcast %cst : f32 to vector<8x512xf32>
    %6 = vector.extract_strided_slice %4 {offsets = [0, 0], sizes = [8, 72], strides = [1, 1]} : vector<10x72xf32> to vector<8x72xf32>
    %7 = arith.truncf %6 : vector<8x72xf32> to vector<8x72xbf16>
    %c0_1 = arith.constant 0 : index
    %c0_2 = arith.constant 0 : index
    %c0_3 = arith.constant 0 : index
    %8 = vector.load %arg3[%c0_1, %c0_2, %c0_3] : memref<3x72x512xbf16, #tpu.memory_space<vmem>>, vector<1x72x512xbf16>
    %9 = vector.shape_cast %8 : vector<1x72x512xbf16> to vector<72x512xbf16>
    %cst_4 = arith.constant dense<0.000000e+00> : vector<8x512xf32>
    %10 = tpu.matmul %7, %9, %cst_4 {dimension_numbers = #tpu.dot_dimension_numbers<[1], [0], [0], [1], [0, 0, 1, 1], [], []>} : vector<8x72xbf16>, vector<72x512xbf16>, vector<8x512xf32> -> vector<8x512xf32>
    %11 = arith.addf %5, %10 : vector<8x512xf32>
    %12 = vector.extract_strided_slice %4 {offsets = [1, 0], sizes = [8, 72], strides = [1, 1]} : vector<10x72xf32> to vector<8x72xf32>
    %13 = arith.truncf %12 : vector<8x72xf32> to vector<8x72xbf16>
    %c1 = arith.constant 1 : index
    %c0_5 = arith.constant 0 : index
    %c0_6 = arith.constant 0 : index
    %14 = vector.load %arg3[%c1, %c0_5, %c0_6] : memref<3x72x512xbf16, #tpu.memory_space<vmem>>, vector<1x72x512xbf16>
    %15 = vector.shape_cast %14 : vector<1x72x512xbf16> to vector<72x512xbf16>
    %cst_7 = arith.constant dense<0.000000e+00> : vector<8x512xf32>
    %16 = tpu.matmul %13, %15, %cst_7 {dimension_numbers = #tpu.dot_dimension_numbers<[1], [0], [0], [1], [0, 0, 1, 1], [], []>} : vector<8x72xbf16>, vector<72x512xbf16>, vector<8x512xf32> -> vector<8x512xf32>
    %17 = arith.addf %11, %16 : vector<8x512xf32>
    %18 = vector.extract_strided_slice %4 {offsets = [2, 0], sizes = [8, 72], strides = [1, 1]} : vector<10x72xf32> to vector<8x72xf32>
    %19 = arith.truncf %18 : vector<8x72xf32> to vector<8x72xbf16>
    %c2 = arith.constant 2 : index
    %c0_8 = arith.constant 0 : index
    %c0_9 = arith.constant 0 : index
    %20 = vector.load %arg3[%c2, %c0_8, %c0_9] : memref<3x72x512xbf16, #tpu.memory_space<vmem>>, vector<1x72x512xbf16>
    %21 = vector.shape_cast %20 : vector<1x72x512xbf16> to vector<72x512xbf16>
    %cst_10 = arith.constant dense<0.000000e+00> : vector<8x512xf32>
    %22 = tpu.matmul %19, %21, %cst_10 {dimension_numbers = #tpu.dot_dimension_numbers<[1], [0], [0], [1], [0, 0, 1, 1], [], []>} : vector<8x72xbf16>, vector<72x512xbf16>, vector<8x512xf32> -> vector<8x512xf32>
    %23 = arith.addf %17, %22 : vector<8x512xf32>
    %c0_11 = arith.constant 0 : index
    %c0_12 = arith.constant 0 : index
    %24 = vector.load %arg4[%c0_11, %c0_12] : memref<1x512xf32, #tpu.memory_space<vmem>>, vector<1x512xf32>
    %25 = vector.broadcast %24 : vector<1x512xf32> to vector<8x512xf32>
    %26 = arith.addf %23, %25 : vector<8x512xf32>
    %cst_13 = arith.constant 0.000000e+00 : f32
    %27 = vector.broadcast %cst_13 : f32 to vector<8x512xf32>
    %28 = arith.maximumf %26, %27 : vector<8x512xf32>
    %c0_14 = arith.constant 0 : index
    %c0_15 = arith.constant 0 : index
    %c0_16 = arith.constant 0 : index
    %29 = vector.load %arg5[%c0_14, %c0_15, %c0_16] : memref<1x8x512xf32, #tpu.memory_space<vmem>>, vector<1x8x512xf32>
    %30 = vector.shape_cast %29 : vector<1x8x512xf32> to vector<8x512xf32>
    %31 = vector.shape_cast %28 : vector<8x512xf32> to vector<1x8x512xf32>
    tpu.vector_store %arg5[%c0_14, %c0_15, %c0_16], %31 {strides = array<i32>} : memref<1x8x512xf32, #tpu.memory_space<vmem>>, vector<1x8x512xf32>,
    return
  }
  func.func @transform_0(%arg0: i32, %arg1: i32) -> (i32, i32, i32) {
    %c0_i32 = arith.constant 0 : i32
    %c0_i32_0 = arith.constant 0 : i32
    %c0_i32_1 = arith.constant 0 : i32
    return %arg0, %c0_i32, %c0_i32_0 : i32, i32, i32
  }
  func.func @transform_1(%arg0: i32, %arg1: i32) -> (i32, i32, i32) {
    %c0_i32 = arith.constant 0 : i32
    %c0_i32_0 = arith.constant 0 : i32
    %c0_i32_1 = arith.constant 0 : i32
    %c0_i32_2 = arith.constant 0 : i32
    return %c0_i32, %c0_i32_0, %c0_i32_1 : i32, i32, i32
  }
  func.func @transform_2(%arg0: i32, %arg1: i32) -> (i32, i32) {
    %c0_i32 = arith.constant 0 : i32
    %c0_i32_0 = arith.constant 0 : i32
    %c0_i32_1 = arith.constant 0 : i32
    return %c0_i32, %c0_i32_0 : i32, i32
  }
  func.func @transform_3(%arg0: i32, %arg1: i32) -> (i32, i32, i32) {
    %c0_i32 = arith.constant 0 : i32
    %c0_i32_0 = arith.constant 0 : i32
    return %arg0, %arg1, %c0_i32 : i32, i32, i32
  }
}

</mosaic_0001>

<bundles_post_ra>
// kernel: _conv3x3_bias_relu.1
= control target key start
LH: loop header
LB: loop body
LE: loop exit
PB: predicated region body
PF: predicated region fallthrough
CT: control target
= control target key end

     0   :  { %8 = vsyncpa [#allocation3], 0  ;;  %s1581_s0 = inlined_call_operand.vmem [shape: f32[2,18,72], index: 0, kind: input, shape index: {}]   ;;  %s1582_s1 = inlined_call_operand.hbm [shape: bf16[3,72,512], index: 1, kind: input, shape index: {}]   ;;  %s1583_s2 = inlined_call_operand.vmem [shape: f32[1,512], index: 2, kind: input, shape index: {}]   ;;  %s1584_s3 = inlined_call_operand.hbm [shape: f32[2,16,512], index: 3, kind: output, shape index: {}]  }
   0x1   :  { %9 = vsyncpa [#allocation4], 0 }
   0x2   :  { %11 = vsyncpa [#allocation4 + $0x1], 0  ;;  %s1382_s12 = smov 0   ;;  %s1384_s13 = smov 0  }
   0x3   :  { %s1386_s14 = smov 0   ;;  %s1388_s15 = smov 0  }
   0x4   :  { %s1390_s16 = smov 0   ;;  %s1392_s17 = smov 0  }
   0x5   :  { %s1394_s18 = smov 0   ;;  %s1396_s19 = smov 0  }
   0x6 LB: > { %s975_s20 = sadd.s32 4294967295, %s1355_s19   ;;  %s976_s21 = sadd.s32 4294967294, %s1355_s19   ;;  %s1355_s19 = sphi %s1396_s19, %s17_s19   ;;  %s1351_s18 = sphi %s1394_s18, %s1596_s18   ;;  %s1347_s17 = sphi %s1392_s17, %s1595_s17   ;;  %s1343_s16 = sphi %s1390_s16, %s1594_s16   ;;  %s1339_s15 = sphi %s1388_s15, %s1593_s15   ;;  %s1335_s14 = sphi %s1386_s14, %s1592_s14   ;;  %s1331_s13 = sphi %s1384_s13, %s1591_s13   ;;  %s1327_s12 = sphi %s1382_s12, %s1590_s12  }
   0x7   : > { %s26_s22 = sadd.s32 1, %s1347_s17  ;;  %s29_s23 = sadd.s32 1, %s1351_s18 }
   0x8   : > { %p27_p0 = scmp.ge.s32.totalorder %s26_s22, 2  ;;  %s106_s24 = sadd.s32 1, %s1335_s14 }
   0x9   : > { %p116_p1 = scmp.ne.s32.totalorder %s1335_s14, %s1331_s13  ;;  %p117_p2 = scmp.eq.s32.totalorder %s975_s20, 3 }
   0xa   : > { %s1598_s22 = smov (%p27_p0, %s26_s22), 0  ;;  %s1600_s23 = smov (!%p27_p0, %s29_s23), %s1351_s18 }
   0xb   : > { %s102_s25 = ssub.s32 %s1347_s17, %s1598_s22  ;;  %p1434_p3 = por %p117_p2, %p116_p1 }
   0xc   : > { %p31_p4 = scmp.ge.s32.totalorder %s1600_s23, 2  ;;  %p122_p5 = scmp.ne.s32.totalorder %s1331_s13, %s1327_s12 }
   0xd   : > { %p123_p6 = scmp.eq.s32.totalorder %s976_s21, 3  ;;  %p977_p7 = scmp.ge.s32.totalorder %s1355_s19, 1 }
   0xe   : > { %s1602_s23 = smov (%p31_p4, %s1600_s23), 0  ;;  %p130_p9 = scmp.lt.s32.totalorder %s1355_s19, 5 }
   0xf   : > { %p1443_p8 = por %p123_p6, %p122_p5  ;;  %s101_s28 = ssub.s32 %s1351_s18, %s1602_s23 }
  0x10   : > { %s103_s29 = sor.u32 %s102_s25, %s101_s28  ;;  %p1450_p10 = pnand %p977_p7, %p130_p9 }
  0x11   : > { %p104_p11 = scmp.eq.s32.totalorder %s103_s29, 0  ;;  %p1454_p12 = scmp.eq.s32.totalorder %s975_s20, 0 }
  0x12   : > { %p1070_p13 = pneg %p1450_p10  ;;  %s1357_s6 = smov [#allocation2]  }
  0x13   : > { %s1461_s5 = scalar_select %p104_p11, %s1335_s14, %s106_s24  }
  0x14   : > { %s142_s7 = sshll.u32 %s1357_s6, 4  ;;  %p1465_p0 = pnand %p1454_p12, %p1070_p13  ;;  %s143_s7 = int_to_ptr.vmem [resolvable:$true] %s142_s7 }
  0x15   : > { %s1244_s9 = scalar_lea.vmem %s143_s7, 6912  ;;  %p1252_p6 = scmp.lt.s32.totalorder %s143_s7, %s143_s7 }
  0x16   : > { %p1235_p1 = pneg %p1465_p0  ;;  %p1245_p2 = scmp.ne.s32.totalorder %s143_s7, %s1244_s9 }
  0x17   : > { %p1253_p7 = scmp.lt.s32.totalorder %s1244_s9, %s1244_s9 }
  0x18   : > { %p1247_p4 = pnand %p1245_p2, %p1235_p1 }
  0x19   : > { %p1254_p9 = por %p1253_p7, %p1252_p6 }
  0x1a   : > { %p1248_p5 = pneg %p1247_p4 }
  0x1c   : > { %p1255_p11 = pnand %p1254_p9, %p1248_p5 }
  0x1e   : > { %1258 = shalt.err (!%p1255_p11)
}
  0x1f   : > { %s1358_s10 = smov 256   ;;  %s1359_s11 = smov 16  }
  0x20   : > { %1073 = dma.hbm_to_vmem [thread:$0]  (!%p1465_p0), %s1582_s1, 6912, %s143_s7, [#allocation3], %s1358_s10, %s1358_s10, %s1359_s11  }
  0x21   : > { %169 = sbr.rel (%p1450_p10) target bundleno = 317 (0x13d), region = 32 }
  0x26   : > { %1318 = dma.done.wait (%p1454_p12), [#allocation3], 6912  }
  0x27   : > { %1320 = vsyncadd (%p1454_p12), [#allocation3], 4294960384  ;;  %p193_p13 = scmp.lt.s32.totalorder %s1343_s16, 1  ;;  %v1360_v0 = vmov 0   ;;  %v240_v1 = vld [vmem:[#allocation2 + $0x110] sm:$0xff]  ;;  %vm343_vm0 = vcmask 1043456  }
  0x28   : > { %388 = vmatprep.mubr.bf16.mxu0 %v1360_v0  ;;  %429 = vmatprep.mubr.bf16.mxu1 %v1360_v0  ;;  %v241_v2 = vld [vmem:[#allocation2 + $0x118] sm:$0xff]  ;;  %v1002_v3 = vcombine.high %v240_v1, %v240_v1  ;;  %v1001_v5 = vcombine.low %v240_v1, %v240_v1  ;;  %v1153_v7 = vld [vmem:[#allocation2 + $0xf4] ss:$16 sps:$4 sm:$0xff]   ;;  %v1157_v11 = vld [vmem:[#allocation2 + $0xf0] ss:$16 sps:$4 sm:$0xff]   ;;  %s984_s4 = sshll.u32 %s1339_s15, 3 }
  0x29   : > { %s194_s24 = scalar_select %p193_p13, %s1343_s16, 1  ;;  %v1004_v4 = vcombine.high %v241_v2, %v241_v2  ;;  %v1003_v6 = vcombine.low %v241_v2, %v241_v2  ;;  %v1155_v8 = vld [vmem:[#allocation2 + $0xfc] ss:$16 sps:$4 sm:$0xff]   ;;  %v1158_v12 = vld [vmem:[#allocation2 + $0xf8] ss:$16 sps:$4 sm:$0xff]   ;;  %v220_v26 = vld [vmem:[#allocation2 + $0x80] sm:$0xff] }
  0x2a   : > { %1005 = vmatprep.subr.msk.bf16.mxu0 %vm343_vm0, %v1002_v3  ;;  %v345_v9 = vsel %vm343_vm0, %v1001_v5, 0  ;;  %v1159_v13 = vld [vmem:[#allocation2 + $0xd4] ss:$16 sps:$4 sm:$0xff]   ;;  %v1161_v14 = vld [vmem:[#allocation2 + $0xdc] ss:$16 sps:$4 sm:$0xff]   ;;  %v1026_v33 = vcombine.high %v220_v26, %v220_v26  ;;  %v1025_v35 = vcombine.low %v220_v26, %v220_v26  ;;  %vm339_vm1 = vcmask 588800  }
  0x2b   : > { %s1063_s25 = smul.u32 24, %s194_s24  ;;  %1007 = vmatprep.subr.msk.bf16.mxu1 %vm343_vm0, %v1004_v4  ;;  %v351_v10 = vsel %vm343_vm0, %v1003_v6, 0  ;;  %363 = vmatpush1.bf16.msra.mxu0 %v345_v9  ;;  %v1163_v15 = vld [vmem:[#allocation2 + $0xd0] ss:$16 sps:$4 sm:$0xff]   ;;  %v1164_v16 = vld [vmem:[#allocation2 + $0xd8] ss:$16 sps:$4 sm:$0xff]  }
  0x2c   : > { %404 = vmatpush1.bf16.msra.mxu1 %v351_v10  ;;  %364 = vmatprep.subr.bf16.mxu0 %v1153_v7  ;;  %v1165_v17 = vld [vmem:[#allocation2 + $0xb4] ss:$16 sps:$4 sm:$0xff]   ;;  %v1167_v18 = vld [vmem:[#allocation2 + $0xbc] ss:$16 sps:$4 sm:$0xff]   ;;  %v1169_v19 = vld [vmem:[#allocation2 + $0xb0] ss:$16 sps:$4 sm:$0xff]  }
  0x2d   : > { %405 = vmatprep.subr.bf16.mxu1 %v1155_v8  ;;  %s197_s30 = scalar_lea.vmem %s1581_s0, %s1063_s25  ;;  %v1170_v22 = vld [vmem:[#allocation2 + $0xb8] ss:$16 sps:$4 sm:$0xff]   ;;  %v1171_v23 = vld [vmem:[#allocation2 + $0x94] ss:$16 sps:$4 sm:$0xff]   ;;  %v1173_v25 = vld [vmem:[#allocation2 + $0x9c] ss:$16 sps:$4 sm:$0xff]  }
  0x2e   : > { %s200_s6 = scalar_lea.vmem %s197_s30, %s984_s4  ;;  %v221_v28 = vld [vmem:[#allocation2 + $0x88] sm:$0xff]  ;;  %v1175_v30 = vld [vmem:[#allocation2 + $0x90] ss:$16 sps:$4 sm:$0xff]   ;;  %v1183_v38 = vld [vmem:[#allocation2 + $0x64] ss:$16 sps:$4 sm:$0xff]   ;;  %v532_v39 = vsel %vm343_vm0, %v1025_v35, 0 }
  0x2f   : > { %365 = vmatpush1.bf16.msra.mxu0 %v1157_v11  ;;  %v1494_v20 = vld [vmem:[%s200_s6] sm:$0xff]  ;;  %v202_v21 = vld [vmem:[%s200_s6 + $0x8] sm:$0x3]  ;;  %v1028_v34 = vcombine.high %v221_v28, %v221_v28  ;;  %v1027_v36 = vcombine.low %v221_v28, %v221_v28  ;;  %v1186_v41 = vld [vmem:[#allocation2 + $0x6c] ss:$16 sps:$4 sm:$0xff]   ;;  %s190_s7 = sand.u32 1, %s1331_s13  }
  0x30   : > { %406 = vmatpush1.bf16.msra.mxu1 %v1158_v12  ;;  %366 = vmatprep.subr.bf16.mxu0 %v1159_v13  ;;  %v1497_v24 = vpack.c.bf16 %v202_v21, %v1494_v20  ;;  %v1176_v31 = vld [vmem:[#allocation2 + $0x98] ss:$16 sps:$4 sm:$0xff]   ;;  %v1181_v42 = vld [vmem:[#allocation2 + $0x60] ss:$16 sps:$4 sm:$0xff]   ;;  %v1189_v44 = vld [vmem:[#allocation2 + $0x44] ss:$16 sps:$4 sm:$0xff]   ;;  %v203_v62 = vpack.c.bf16 %v1494_v20, %v1494_v20 }
  0x31   : > { %407 = vmatprep.subr.bf16.mxu1 %v1161_v14  ;;  %v538_v40 = vsel %vm343_vm0, %v1027_v36, 0  ;;  %v1184_v43 = vld [vmem:[#allocation2 + $0x68] ss:$16 sps:$4 sm:$0xff]   ;;  %v1192_v45 = vld [vmem:[#allocation2 + $0x4c] ss:$16 sps:$4 sm:$0xff]   ;;  %v642_v54 = vld [vmem:[#allocation2 + $0x1a0] sm:$0xff] }
  0x32   : > { %v245_v27 = vshll.u32 %v1497_v24, 16  ;;  %v243_v29 = vshrl.u32 %v1497_v24, 16  ;;  %v1187_v46 = vld [vmem:[#allocation2 + $0x40] ss:$16 sps:$4 sm:$0xff]   ;;  %v1190_v47 = vld [vmem:[#allocation2 + $0x48] ss:$16 sps:$4 sm:$0xff]   ;;  %v1050_v58 = vcombine.high %v642_v54, %v642_v54  ;;  %v1049_v60 = vcombine.low %v642_v54, %v642_v54 }
  0x33   : > { %367 = vmatpush1.bf16.msra.mxu0 %v1163_v15  ;;  %v1195_v48 = vld [vmem:[#allocation2 + $0x24] ss:$16 sps:$4 sm:$0xff]   ;;  %v1198_v49 = vld [vmem:[#allocation2 + $0x2c] ss:$16 sps:$4 sm:$0xff]   ;;  %v1193_v50 = vld [vmem:[#allocation2 + $0x20] ss:$16 sps:$4 sm:$0xff]  }
  0x34   : > { %408 = vmatpush1.bf16.msra.mxu1 %v1164_v16  ;;  %368 = vmatprep.subr.bf16.mxu0 %v1165_v17  ;;  %v247_v32 = vrot.slane %v245_v27, 1  ;;  %v1196_v51 = vld [vmem:[#allocation2 + $0x28] ss:$16 sps:$4 sm:$0xff]   ;;  %v1201_v52 = vld [vmem:[#allocation2 + $0x4] ss:$16 sps:$4 sm:$0xff]   ;;  %v740_v63 = vsel %vm343_vm0, %v1049_v60, 0 }
  0x35   : > { %409 = vmatprep.subr.bf16.mxu1 %v1167_v18  ;;  %v1204_v53 = vld [vmem:[#allocation2 + $0xc] ss:$16 sps:$4 sm:$0xff]   ;;  %v1199_v56 = vld [vmem:[#allocation2] ss:$16 sps:$4 sm:$0xff]   ;;  %v1202_v57 = vld [vmem:[#allocation2 + $0x8] ss:$16 sps:$4 sm:$0xff]  }
  0x36   : > { %v248_v37 = vor.u32 %v247_v32, %v243_v29  ;;  %v643_v55 = vld [vmem:[#allocation2 + $0x1a8] sm:$0xff]  ;;  %v1211_v2 = vld [vmem:[#allocation2 + $0x184] ss:$16 sps:$4 sm:$0xff]   ;;  %v1209_v4 = vld [vmem:[#allocation2 + $0x180] ss:$16 sps:$4 sm:$0xff]   ;;  %v645_v17 = vrot.slane %v1497_v24, 1 }
  0x37   : > { %369 = vmatpush1.bf16.msra.mxu0 %v1169_v19  ;;  %v1052_v59 = vcombine.high %v643_v55, %v643_v55  ;;  %v1051_v61 = vcombine.low %v643_v55, %v643_v55  ;;  %v1214_v3 = vld [vmem:[#allocation2 + $0x18c] ss:$16 sps:$4 sm:$0xff]   ;;  %v1212_v5 = vld [vmem:[#allocation2 + $0x188] ss:$16 sps:$4 sm:$0xff]   ;;  %v1217_v6 = vld [vmem:[#allocation2 + $0x164] ss:$16 sps:$4 sm:$0xff]  }
  0x38   : > { %410 = vmatpush1.bf16.msra.mxu1 %v1170_v22  ;;  %370 = vmatprep.subr.bf16.mxu0 %v1171_v23  ;;  %v1220_v7 = vld [vmem:[#allocation2 + $0x16c] ss:$16 sps:$4 sm:$0xff]   ;;  %v1215_v8 = vld [vmem:[#allocation2 + $0x160] ss:$16 sps:$4 sm:$0xff]   ;;  %v1218_v9 = vld [vmem:[#allocation2 + $0x168] ss:$16 sps:$4 sm:$0xff]  }
  0x39   : > { %411 = vmatprep.subr.bf16.mxu1 %v1173_v25  ;;  %v746_v1 = vsel %vm343_vm0, %v1051_v61, 0  ;;  %v1223_v10 = vld [vmem:[#allocation2 + $0x144] ss:$16 sps:$4 sm:$0xff]   ;;  %v1226_v11 = vld [vmem:[#allocation2 + $0x14c] ss:$16 sps:$4 sm:$0xff]   ;;  %s982_s10 = sshll.u32 %s190_s7, 5 }
  0x3a   : > { %v1221_v12 = vld [vmem:[#allocation2 + $0x140] ss:$16 sps:$4 sm:$0xff]   ;;  %v1224_v13 = vld [vmem:[#allocation2 + $0x148] ss:$16 sps:$4 sm:$0xff]   ;;  %v1229_v14 = vld [vmem:[#allocation2 + $0x124] ss:$16 sps:$4 sm:$0xff]  }
  0x3b   : > { %371 = vmatpush1.bf16.msra.mxu0 %v1175_v30  ;;  %v1232_v15 = vld [vmem:[#allocation2 + $0x12c] ss:$16 sps:$4 sm:$0xff]   ;;  %v1227_v16 = vld [vmem:[#allocation2 + $0x120] ss:$16 sps:$4 sm:$0xff]   ;;  %s1058_s11 = sshll.u32 %s1339_s15, 2  ;;  %s1059_s20 = sshll.u32 %s1343_s16, 3 }
  0x3c   : > { %412 = vmatpush1.bf16.msra.mxu1 %v1176_v31  ;;  %1029 = vmatprep.subr.msk.bf16.mxu0 %vm343_vm0, %v1026_v33  ;;  %s884_s21 = sadd.s32 %s1059_s20, %s1058_s11  ;;  %s192_s16 = scalar_lea.vmem [#allocation5], %s982_s10 }
  0x3d   : > { %1031 = vmatprep.subr.msk.bf16.mxu1 %vm343_vm0, %v1028_v34  ;;  %v839_v34 = vlaneseq  ;;  %s1060_s15 = sshll.u32 %s884_s21, 7  ;;  %s888_s24 = sshll.u32 %s192_s16, 4  ;;  %s889_s24 = int_to_ptr.vmem [resolvable:$true] %s888_s24 }
  0x3e   : > { %1006 = vmatmul.mubr.msk.bf16.vlgmr.msra.gmra.mxu0 %vm339_vm1, %v248_v37  ;;  %s1533_s29 = scalar_lea.hbm %s1584_s3, %s1060_s15  ;;  %s872_s30 = scalar_lea.sflag [#allocation4], %s190_s7 }
  0x3f   : > { %1008 = vmatmul.mubr.msk.bf16.vlgmr.msra.gmra.mxu1 %vm339_vm1, %v248_v37  ;;  %550 = vmatpush1.bf16.msra.mxu0 %v532_v39  ;;  %v840_v35 = vshrl.u32 %v839_v34, 7  ;;  %s1259_s4 = scalar_lea.vmem %s889_s24, 512  ;;  %s1361_s6 = smov [#allocation5]  }
  0x40   : > { %591 = vmatpush1.bf16.msra.mxu1 %v538_v40  ;;  %551 = vmatprep.subr.bf16.mxu0 %v1183_v38  ;;  %v837_v38 = vld [vmem:[%s1583_s2] sm:$0xf]  ;;  %p1260_p10 = scmp.ne.s32.totalorder %s889_s24, %s1259_s4  ;;  %s1263_s8 = sshll.u32 %s1361_s6, 4  ;;  %s1264_s8 = int_to_ptr.vmem [resolvable:$false] %s1263_s8 }
  0x41   : > { %592 = vmatprep.subr.bf16.mxu1 %v1186_v41  ;;  %575 = vmatprep.mubr.bf16.mxu0 %v1360_v0  ;;  %v841_v36 = vsub.s32 0, %v840_v35  ;;  %v849_v37 = vsub.s32 2, %v840_v35  ;;  %v845_v39 = vsub.s32 1, %v840_v35  ;;  %v853_v40 = vsub.s32 3, %v840_v35  ;;  %s1265_s9 = scalar_lea.vmem %s1264_s8, 1024  ;;  %p1266_p1 = scmp.lt.s32.totalorder %s889_s24, %s1264_s8 }
  0x42   : > { %616 = vmatprep.mubr.bf16.mxu1 %v1360_v0  ;;  %p1261_p12 = pnand %p1260_p10, %p1434_p3  ;;  %p1267_p2 = scmp.lt.s32.totalorder %s1265_s9, %s1259_s4 }
  0x43   : > { %552 = vmatpush1.bf16.msra.mxu0 %v1181_v42 }
  0x44   : > { %593 = vmatpush1.bf16.msra.mxu1 %v1184_v43  ;;  %553 = vmatprep.subr.bf16.mxu0 %v1189_v44  ;;  %v842_v43 = vrot.slane %v837_v38, %v841_v36  ;;  %v850_v44 = vrot.slane %v837_v38, %v849_v37  ;;  %p1262_p0 = pneg %p1261_p12  ;;  %p1268_p4 = por %p1267_p2, %p1266_p1 }
  0x45   : > { %594 = vmatprep.subr.bf16.mxu1 %v1192_v45 }
  0x46   : > { %p1269_p5 = pnand %p1268_p4, %p1262_p0 }
  0x47   : > { %554 = vmatpush1.bf16.msra.mxu0 %v1187_v46 }
  0x48   : > { %595 = vmatpush1.bf16.msra.mxu1 %v1190_v47  ;;  %555 = vmatprep.subr.bf16.mxu0 %v1195_v48  ;;  %v846_v47 = vrot.slane %v837_v38, %v845_v39  ;;  %v854_v48 = vrot.slane %v837_v38, %v853_v40 }
  0x49   : > { %596 = vmatprep.subr.bf16.mxu1 %v1198_v49 }
  0x4b   : > { %556 = vmatpush1.bf16.msra.mxu0 %v1193_v50 }
  0x4c   : > { %597 = vmatpush1.bf16.msra.mxu1 %v1196_v51  ;;  %557 = vmatprep.subr.bf16.mxu0 %v1201_v52 }
  0x4d   : > { %598 = vmatprep.subr.bf16.mxu1 %v1204_v53 }
  0x4f   : > { %558 = vmatpush1.bf16.msra.mxu0 %v1199_v56 }
  0x50   : > { %599 = vmatpush1.bf16.msra.mxu1 %v1202_v57  ;;  %1053 = vmatprep.subr.msk.bf16.mxu0 %vm343_vm0, %v1050_v58 }
  0x51   : > { %1055 = vmatprep.subr.msk.bf16.mxu1 %vm343_vm0, %v1052_v59 }
  0x52   : > { %1030 = vmatmul.mubr.msk.bf16.vlgmr.msra.gmra.mxu0 %vm339_vm1, %v203_v62 }
  0x53   : > { %1032 = vmatmul.mubr.msk.bf16.vlgmr.msra.gmra.mxu1 %vm339_vm1, %v203_v62  ;;  %758 = vmatpush1.bf16.msra.mxu0 %v740_v63 }
  0x54   : > { %799 = vmatpush1.bf16.msra.mxu1 %v746_v1  ;;  %759 = vmatprep.subr.bf16.mxu0 %v1211_v2 }
  0x55   : > { %800 = vmatprep.subr.bf16.mxu1 %v1214_v3  ;;  %783 = vmatprep.mubr.bf16.mxu0 %v1360_v0 }
  0x56   : > { %824 = vmatprep.mubr.bf16.mxu1 %v1360_v0  ;;  %v1230_v0 = vld [vmem:[#allocation2 + $0x128] ss:$16 sps:$4 sm:$0xff]  }
  0x57   : > { %760 = vmatpush1.bf16.msra.mxu0 %v1209_v4 }
  0x58   : > { %801 = vmatpush1.bf16.msra.mxu1 %v1212_v5  ;;  %761 = vmatprep.subr.bf16.mxu0 %v1217_v6 }
  0x59   : > { %802 = vmatprep.subr.bf16.mxu1 %v1220_v7 }
  0x5b   : > { %762 = vmatpush1.bf16.msra.mxu0 %v1215_v8 }
  0x5c   : > { %803 = vmatpush1.bf16.msra.mxu1 %v1218_v9  ;;  %763 = vmatprep.subr.bf16.mxu0 %v1223_v10 }
  0x5d   : > { %804 = vmatprep.subr.bf16.mxu1 %v1226_v11 }
  0x5f   : > { %764 = vmatpush1.bf16.msra.mxu0 %v1221_v12 }
  0x60   : > { %805 = vmatpush1.bf16.msra.mxu1 %v1224_v13  ;;  %765 = vmatprep.subr.bf16.mxu0 %v1229_v14 }
  0x61   : > { %806 = vmatprep.subr.bf16.mxu1 %v1232_v15 }
  0x63   : > { %766 = vmatpush1.bf16.msra.mxu0 %v1227_v16 }
  0x64   : > { %807 = vmatpush1.bf16.msra.mxu1 %v1230_v0 }
  0x66   : > { %1054 = vmatmul.mubr.msk.bf16.vlgmr.msra.gmra.mxu0 %vm339_vm1, %v645_v17 }
  0x67   : > { %1056 = vmatmul.mubr.msk.bf16.vlgmr.msra.gmra.mxu1 %vm339_vm1, %v645_v17 }
  0xfe   : > { %v390_v18 = vpop.f32.mrf.mxu0 }
  0xff   : > { %v431_v19 = vpop.f32.mrf.mxu1 }
 0x100   : > { %v392_v20 = vpop.f32.mrf.mxu0 }
 0x101   : > { %v433_v21 = vpop.f32.mrf.mxu1 }
 0x102   : > { %v394_v22 = vpop.f32.mrf.mxu0 }
 0x103   : > { %v435_v23 = vpop.f32.mrf.mxu1 }
 0x104   : > { %v395_v25 = vpop.f32.mrf.mxu0 }
 0x105   : > { %v436_v26 = vpop.f32.mrf.mxu1 }
 0x112   : > { %v577_v27 = vpop.f32.mrf.mxu0 }
 0x113   : > { %v618_v28 = vpop.f32.mrf.mxu1  ;;  %v578_v41 = vadd.f32 %v577_v27, %v390_v18 }
 0x114   : > { %v579_v24 = vpop.f32.mrf.mxu0  ;;  %v619_v42 = vadd.f32 %v618_v28, %v431_v19 }
 0x115   : > { %v620_v29 = vpop.f32.mrf.mxu1  ;;  %v580_v49 = vadd.f32 %v579_v24, %v392_v20 }
 0x116   : > { %v581_v30 = vpop.f32.mrf.mxu0  ;;  %v621_v50 = vadd.f32 %v620_v29, %v433_v21 }
 0x117   : > { %v622_v31 = vpop.f32.mrf.mxu1 }
 0x118   : > { %v582_v32 = vpop.f32.mrf.mxu0 }
 0x119   : > { %v623_v33 = vpop.f32.mrf.mxu1 }
 0x126   : > { %v785_v45 = vpop.f32.mrf.mxu0 }
 0x127   : > { %v826_v46 = vpop.f32.mrf.mxu1  ;;  %v833_v51 = vadd.f32 %v785_v45, %v578_v41 }
 0x128   : > { %v835_v52 = vadd.f32 %v826_v46, %v619_v42  ;;  %v787_v53 = vpop.f32.mrf.mxu0 }
 0x129   : > { %v828_v54 = vpop.f32.mrf.mxu1  ;;  %v859_v55 = vadd.f32 %v842_v43, %v833_v51  ;;  %v834_v57 = vadd.f32 %v787_v53, %v580_v49 }
 0x12a   : > { %v861_v56 = vadd.f32 %v850_v44, %v835_v52  ;;  %v836_v58 = vadd.f32 %v828_v54, %v621_v50  ;;  %v789_v59 = vpop.f32.mrf.mxu0 }
 0x12b   : > { %v830_v60 = vpop.f32.mrf.mxu1  ;;  %v863_v61 = vmax.f32 %v859_v55, 0.0  ;;  %v860_v63 = vadd.f32 %v846_v47, %v834_v57 }
 0x12c   : > { %v865_v62 = vmax.f32 %v861_v56, 0.0  ;;  %v862_v1 = vadd.f32 %v854_v48, %v836_v58  ;;  %v790_v2 = vpop.f32.mrf.mxu0 }
 0x12d   : > { %v831_v3 = vpop.f32.mrf.mxu1  ;;  %867 = vst [vmem:[%s192_s16] sm:$0xff] %v863_v61  ;;  %v864_v4 = vmax.f32 %v860_v63, 0.0 }
 0x12e   : > { %869 = vst [vmem:[%s192_s16 + $0x10] sm:$0xff] %v865_v62  ;;  %v866_v5 = vmax.f32 %v862_v1, 0.0 }
 0x12f   : > { %868 = vst [vmem:[%s192_s16 + $0x8] sm:$0xff] %v864_v4 }
 0x130   : > { %870 = vst [vmem:[%s192_s16 + $0x18] sm:$0xff] %v866_v5 }
 0x131   : > { %1272 = shalt.err (!%p1269_p5)
}
 0x132   : > { %s1273_s10 = scalar_lea.hbm %s1533_s29, 512  ;;  %s1277_s20 = scalar_lea.hbm %s1584_s3, 2048 }
 0x133   : > { %p1274_p6 = scmp.ne.s32.totalorder %s1533_s29, %s1273_s10  ;;  %p1278_p11 = scmp.lt.s32.totalorder %s1533_s29, %s1584_s3 }
 0x134   : > { %p1279_p13 = scmp.lt.s32.totalorder %s1277_s20, %s1273_s10 }
 0x135   : > { %p1275_p7 = pnand %p1274_p6, %p1434_p3 }
 0x136   : > { %p1280_p10 = por %p1279_p13, %p1278_p11 }
 0x137   : > { %p1276_p9 = pneg %p1275_p7 }
 0x139   : > { %p1281_p12 = pnand %p1280_p10, %p1276_p9 }
 0x13b   : > { %1284 = shalt.err (!%p1281_p12)
}
 0x13c   : > { %1068 = dma.vmem_to_hbm [thread:$0]  (%p1434_p3), %s889_s24, 512, %s1533_s29, %s872_s30  }
 0x13d PF: > { %p1080_p0 = scmp.ge.s32.totalorder %s1355_s19, 2  ;;  %s900_s16 = sand.u32 1, %s1327_s12  }
 0x13e   : > { %s901_s25 = scalar_lea.sflag [#allocation4], %s900_s16 }
 0x13f   : > { %p1075_p1 = pnand %p1080_p0, %p1443_p8 }
 0x141   : > { %p1076_p2 = pneg %p1075_p1 }
 0x143   : > { %1322 = dma.done.wait (%p1076_p2), %s901_s25, 512  }
 0x144   : > { %1324 = vsyncadd (%p1076_p2), %s901_s25, 4294966784  ;;  %s17_s19 = sadd.s32 1, %s1355_s19   ;;  %s1590_s12 = smov %s1331_s13 }
 0x145   : > { %p14_p4 = scmp.ge.s32.totalorder %s17_s19, 6   ;;  %s1591_s13 = smov %s1335_s14 }
 0x146   : > { %s1592_s14 = smov %s1461_s5  ;;  %s1593_s15 = smov %s1347_s17 }
 0x147   : > { %s1594_s16 = smov %s1351_s18  ;;  %s1595_s17 = smov %s1598_s22 }
 0x148   : > { %s1596_s18 = smov %s1602_s23  ;;  %16 = sbr.rel (!%p14_p4) target bundleno = 6 (0x6), region = 75 }
 0x14d   :  { %906 = vsyncpa [#allocation3], 1 }
 0x14e   :  { %908 = vsyncpa [#allocation3 + $0x1], 1 }
 0x14f   :  { %909 = vsyncpa [#allocation4], 1 }
 0x150   :  { %911 = vsyncpa [#allocation4 + $0x1], 1 }

</bundles_post_ra>
